<compile_context>
chip_gen: v6e
topology: v6e:2x2x1
jax: 0.10.0
libtpu: 0.0.40
codegen_flags: <defaults>
</compile_context>

<pallas_src>
import functools

import jax
import jax.numpy as jnp
from jax.experimental import pallas as pl
from jax.experimental.pallas import tpu as pltpu


def _round_up(x, m):
    return ((x + m - 1) // m) * m


# --------------- Stage 1: H = X @ W  (feature transform, executed once) ---------------
def _feature_transform_kernel(x_ref, w_ref, h_ref):
    h_ref[...] = jnp.dot(
        x_ref[...], w_ref[...], preferred_element_type=jnp.float32
    ).astype(h_ref.dtype)


# --------------- Stage 2: out = relu(A_norm @ H + b), K-tiled accumulation ------------
def _aggregate_bias_relu_kernel(a_ref, h_ref, b_ref, o_ref, acc_ref):
    # a_ref: (tm, tk) adjacency tile, h_ref: (tk, D) transformed-feature tile,
    # b_ref: (1, D) bias, o_ref: (tm, D) output tile, acc_ref: (tm, D) f32 accumulator
    k = pl.program_id(1)

    @pl.when(k == 0)
    def _():
        acc_ref[...] = jnp.zeros_like(acc_ref)

    acc_ref[...] += jnp.dot(a_ref[...], h_ref[...], preferred_element_type=jnp.float32)

    @pl.when(k == pl.num_programs(1) - 1)
    def _():
        out = acc_ref[...] + b_ref[...]          # bias broadcast, f32
        o_ref[...] = jnp.maximum(out, 0.0).astype(o_ref.dtype)   # ReLU


@functools.partial(jax.jit, static_argnames=("block_rows", "block_k", "compute_dtype"))
def shared_encoder_forward(
    x, a_norm, weight, bias, *, block_rows=256, block_k=512, compute_dtype=jnp.float32
):
    n, in_feats = x.shape
    out_dim = weight.shape[1]

    # Lane-dense padding of feature dims (last dim multiple of 128 lanes).
    f_pad = _round_up(in_feats, 128)
    d_pad = _round_up(out_dim, 128)

    # Tile sizes, clamped for tiny graphs.  When a tile is narrower than 128 lanes
    # it spans the full (padded) dimension, so the (8,128) constraint always holds.
    tm = min(block_rows, _round_up(n, 8))     # output / A row tile
    tk = min(block_k, _round_up(n, 8))        # contraction tile over nodes
    n_row_pad = _round_up(n, tm)              # rows of A / rows of output
    n_k_pad = _round_up(n, tk)                # cols of A / rows of H

    cd = compute_dtype
    isz = jnp.dtype(cd).itemsize
    a_p = jnp.pad(a_norm.astype(cd), ((0, n_row_pad - n), (0, n_k_pad - n)))
    x_p = jnp.pad(x.astype(cd), ((0, n_k_pad - n), (0, f_pad - in_feats)))
    w_p = jnp.pad(weight.astype(cd), ((0, f_pad - in_feats), (0, d_pad - out_dim)))
    b_p = jnp.pad(bias.astype(jnp.float32), ((0, 0), (0, d_pad - out_dim)))

    # ---- Stage 1: H = X @ W  (computed exactly once, tiled over node rows) ----
    h = pl.pallas_call(
        _feature_transform_kernel,
        out_shape=jax.ShapeDtypeStruct((n_k_pad, d_pad), cd),
        grid_spec=pltpu.PrefetchScalarGridSpec(
            num_scalar_prefetch=0,
            grid=(n_k_pad // tk,),
            in_specs=[
                pl.BlockSpec((tk, f_pad), lambda i: (i, 0)),
                pl.BlockSpec((f_pad, d_pad), lambda i: (0, 0)),
            ],
            out_specs=pl.BlockSpec((tk, d_pad), lambda i: (i, 0)),
        ),
        compiler_params=pltpu.CompilerParams(
            dimension_semantics=("parallel",),
            vmem_limit_bytes=48 << 20,
        ),
        cost_estimate=pl.CostEstimate(
            flops=2 * n_k_pad * f_pad * d_pad,
            transcendentals=0,
            bytes_accessed=(n_k_pad * f_pad + f_pad * d_pad + n_k_pad * d_pad) * isz,
        ),
    )(x_p, w_p)

    # ---- Stage 2: out = relu(A_norm @ H + b), (row, K)-tiled accumulator ----
    grid = (n_row_pad // tm, n_k_pad // tk)
    out_p = pl.pallas_call(
        _aggregate_bias_relu_kernel,
        out_shape=jax.ShapeDtypeStruct((n_row_pad, d_pad), jnp.float32),
        grid_spec=pltpu.PrefetchScalarGridSpec(
            num_scalar_prefetch=0,
            grid=grid,
            in_specs=[
                pl.BlockSpec((tm, tk), lambda i, k: (i, k)),      # A_norm tile
                pl.BlockSpec((tk, d_pad), lambda i, k: (k, 0)),   # H tile
                pl.BlockSpec((1, d_pad), lambda i, k: (0, 0)),    # bias
            ],
            out_specs=pl.BlockSpec((tm, d_pad), lambda i, k: (i, 0)),
            scratch_shapes=[pltpu.VMEM((tm, d_pad), jnp.float32)],
        ),
        compiler_params=pltpu.CompilerParams(
            dimension_semantics=("parallel", "arbitrary"),
            vmem_limit_bytes=48 << 20,
        ),
        cost_estimate=pl.CostEstimate(
            flops=2 * n_row_pad * n_k_pad * d_pad,
            transcendentals=0,
            bytes_accessed=(n_row_pad * n_k_pad + n_k_pad * d_pad) * isz
            + n_row_pad * d_pad * 4,
        ),
    )(a_p, h, b_p)

    return out_p[:n, :out_dim]


def build_normalized_adjacency(edge_index, num_nodes):
    """Plain-JAX glue: dense A (scatter-ADD so duplicate edges accumulate, matching
    PyG message-sum semantics) + remaining self-loops (weight exactly 1) + symmetric
    D^-1/2 normalization.  This is what CachedGCNConv caches per `cache_name`."""
    src, dst = edge_index[0], edge_index[1]
    a = jnp.zeros((num_nodes, num_nodes), jnp.float32)
    a = a.at[dst, src].add(1.0)                      # message from src -> dst
    diag = jnp.arange(num_nodes)
    a = a.at[diag, diag].set(1.0)                    # add_remaining_self_loops(fill=1)
    deg = jnp.sum(a, axis=1)
    d_inv_sqrt = jnp.where(deg > 0.0, jax.lax.rsqrt(jnp.maximum(deg, 1e-12)), 0.0)
    return d_inv_sqrt[:, None] * a * d_inv_sqrt[None, :]


def reference_forward(x, a_norm, weight, bias):
    return jax.nn.relu(a_norm @ (x @ weight) + bias)


if __name__ == "__main__":
    key = jax.random.PRNGKey(0)
    k_x1, k_e1, k_w, k_x2, k_e2 = jax.random.split(key, 5)

    in_feats = 8
    out_dim = 32

    # shapes from CachedGCNConv(in_feats, out_dim); glorot-ish deterministic init
    weight = jax.random.normal(k_w, (in_feats, out_dim), dtype=jnp.float32) * (
        (2.0 / (in_feats + out_dim)) ** 0.5
    )
    bias = jnp.zeros((1, out_dim), dtype=jnp.float32)

    # ---- test 1: tiny graph (tiles clamp to a single block) --------------------
    n1, e1 = 16, 40
    x1 = jax.random.normal(k_x1, (n1, in_feats), dtype=jnp.float32)
    ei1 = jax.random.randint(k_e1, (2, e1), 0, n1, dtype=jnp.int32)
    a1 = build_normalized_adjacency(ei1, n1)

    out1 = jax.block_until_ready(shared_encoder_forward(x1, a1, weight, bias))
    ref1 = reference_forward(x1, a1, weight, bias)
    assert out1.shape == (n1, out_dim)
    assert jnp.allclose(out1, ref1, atol=1e-4, rtol=1e-4), "mismatch vs reference (tiny)"

    # ---- test 2: larger graph exercising the (row, K)-tiled accumulator --------
    n2, e2 = 256, 1024
    x2 = jax.random.normal(k_x2, (n2, in_feats), dtype=jnp.float32)
    ei2 = jax.random.randint(k_e2, (2, e2), 0, n2, dtype=jnp.int32)
    a2 = build_normalized_adjacency(ei2, n2)

    out2 = jax.block_until_ready(
        shared_encoder_forward(x2, a2, weight, bias, block_rows=128, block_k=128)
    )
    ref2 = reference_forward(x2, a2, weight, bias)
    assert out2.shape == (n2, out_dim)
    assert jnp.allclose(out2, ref2, atol=1e-4, rtol=1e-4), "mismatch vs reference (tiled)"

    # ---- test 3: bf16 compute path (v6e/v7x MXU), f32 accumulation --------------
    out3 = jax.block_until_ready(
        shared_encoder_forward(
            x2, a2, weight, bias,
            block_rows=128, block_k=128, compute_dtype=jnp.bfloat16,
        )
    )
    assert out3.shape == (n2, out_dim)
    assert jnp.allclose(out3, ref2, atol=5e-2, rtol=5e-2), "mismatch vs reference (bf16)"

    print("KERNEL_OK")
</pallas_src>

<mosaic_0001>
module attributes {stable_mosaic.version = 11 : i64} {
  func.func @_feature_transform_kernel(%arg0: i32, %arg1: memref<16x128xf32, #tpu.memory_space<vmem>>, %arg2: memref<128x128xf32, #tpu.memory_space<vmem>>, %arg3: memref<16x128xf32, #tpu.memory_space<vmem>>) attributes {dimension_semantics = [#tpu.dimension_semantics<parallel>], iteration_bounds = array<i64: 1>, scalar_prefetch = 0 : i64, scratch_operands = 0 : i64, tpu.core_type = #tpu.core_type<tc>, window_params = [{transform_indices = @transform_0, window_bounds = array<i64: 16, 128>}, {pipeline_mode = #tpu.pipeline_mode<synchronous>, transform_indices = @transform_1, window_bounds = array<i64: 128, 128>}, {transform_indices = @transform_2, window_bounds = array<i64: 16, 128>}]} {
    %c0 = arith.constant 0 : index
    %c0_0 = arith.constant 0 : index
    %0 = vector.load %arg1[%c0, %c0_0] : memref<16x128xf32, #tpu.memory_space<vmem>>, vector<16x128xf32>
    %c0_1 = arith.constant 0 : index
    %c0_2 = arith.constant 0 : index
    %1 = vector.load %arg2[%c0_1, %c0_2] : memref<128x128xf32, #tpu.memory_space<vmem>>, vector<128x128xf32>
    %cst = arith.constant dense<0.000000e+00> : vector<16x128xf32>
    %2 = tpu.matmul %0, %1, %cst {dimension_numbers = #tpu.dot_dimension_numbers<[1], [0], [0], [1], [0, 0, 1, 1], [], []>} : vector<16x128xf32>, vector<128x128xf32>, vector<16x128xf32> -> vector<16x128xf32>
    %c0_3 = arith.constant 0 : index
    %c0_4 = arith.constant 0 : index
    %3 = vector.load %arg3[%c0_3, %c0_4] : memref<16x128xf32, #tpu.memory_space<vmem>>, vector<16x128xf32>
    tpu.vector_store %arg3[%c0_3, %c0_4], %2 {strides = array<i32>} : memref<16x128xf32, #tpu.memory_space<vmem>>, vector<16x128xf32>,
    return
  }
  func.func @transform_0(%arg0: i32) -> (i32, i32) {
    %c0_i32 = arith.constant 0 : i32
    %c0_i32_0 = arith.constant 0 : i32
    return %arg0, %c0_i32 : i32, i32
  }
  func.func @transform_1(%arg0: i32) -> (i32, i32) {
    %c0_i32 = arith.constant 0 : i32
    %c0_i32_0 = arith.constant 0 : i32
    %c0_i32_1 = arith.constant 0 : i32
    return %c0_i32, %c0_i32_0 : i32, i32
  }
  func.func @transform_2(%arg0: i32) -> (i32, i32) {
    %c0_i32 = arith.constant 0 : i32
    %c0_i32_0 = arith.constant 0 : i32
    return %arg0, %c0_i32 : i32, i32
  }
}

module attributes {stable_mosaic.version = 11 : i64} {
  func.func @_aggregate_bias_relu_kernel(%arg0: i32, %arg1: i32, %arg2: memref<16x16xf32, #tpu.memory_space<vmem>>, %arg3: memref<16x128xf32, #tpu.memory_space<vmem>>, %arg4: memref<1x128xf32, #tpu.memory_space<vmem>>, %arg5: memref<16x128xf32, #tpu.memory_space<vmem>>, %arg6: memref<16x128xf32, #tpu.memory_space<vmem>>) attributes {dimension_semantics = [#tpu.dimension_semantics<parallel>, #tpu.dimension_semantics<arbitrary>], iteration_bounds = array<i64: 1, 1>, scalar_prefetch = 0 : i64, scratch_operands = 1 : i64, tpu.core_type = #tpu.core_type<tc>, window_params = [{transform_indices = @transform_0, window_bounds = array<i64: 16, 16>}, {transform_indices = @transform_1, window_bounds = array<i64: 16, 128>}, {pipeline_mode = #tpu.pipeline_mode<synchronous>, transform_indices = @transform_2, window_bounds = array<i64: 1, 128>}, {transform_indices = @transform_3, window_bounds = array<i64: 16, 128>}]} {
    %c0_i32 = arith.constant 0 : i32
    %0 = arith.cmpi eq, %arg1, %c0_i32 : i32
    %1 = arith.extui %0 : i1 to i32
    %c0_i32_0 = arith.constant 0 : i32
    %2 = arith.cmpi ne, %1, %c0_i32_0 : i32
    scf.if %2 {
      %cst_10 = arith.constant 0.000000e+00 : f32
      %12 = vector.broadcast %cst_10 : f32 to vector<16x128xf32>
      %c0_11 = arith.constant 0 : index
      %c0_12 = arith.constant 0 : index
      %13 = vector.load %arg6[%c0_11, %c0_12] : memref<16x128xf32, #tpu.memory_space<vmem>>, vector<16x128xf32>
      tpu.vector_store %arg6[%c0_11, %c0_12], %12 {strides = array<i32>} : memref<16x128xf32, #tpu.memory_space<vmem>>, vector<16x128xf32>,
    } else {
    }
    %c0 = arith.constant 0 : index
    %c0_1 = arith.constant 0 : index
    %3 = vector.load %arg6[%c0, %c0_1] : memref<16x128xf32, #tpu.memory_space<vmem>>, vector<16x128xf32>
    %c0_2 = arith.constant 0 : index
    %c0_3 = arith.constant 0 : index
    %4 = vector.load %arg2[%c0_2, %c0_3] : memref<16x16xf32, #tpu.memory_space<vmem>>, vector<16x16xf32>
    %c0_4 = arith.constant 0 : index
    %c0_5 = arith.constant 0 : index
    %5 = vector.load %arg3[%c0_4, %c0_5] : memref<16x128xf32, #tpu.memory_space<vmem>>, vector<16x128xf32>
    %cst = arith.constant dense<0.000000e+00> : vector<16x128xf32>
    %6 = tpu.matmul %4, %5, %cst {dimension_numbers = #tpu.dot_dimension_numbers<[1], [0], [0], [1], [0, 0, 1, 1], [], []>} : vector<16x16xf32>, vector<16x128xf32>, vector<16x128xf32> -> vector<16x128xf32>
    %7 = arith.addf %3, %6 : vector<16x128xf32>
    %c0_6 = arith.constant 0 : index
    %c0_7 = arith.constant 0 : index
    %8 = vector.load %arg6[%c0_6, %c0_7] : memref<16x128xf32, #tpu.memory_space<vmem>>, vector<16x128xf32>
    tpu.vector_store %arg6[%c0_6, %c0_7], %7 {strides = array<i32>} : memref<16x128xf32, #tpu.memory_space<vmem>>, vector<16x128xf32>,
    %c0_i32_8 = arith.constant 0 : i32
    %9 = arith.cmpi eq, %arg1, %c0_i32_8 : i32
    %10 = arith.extui %9 : i1 to i32
    %c0_i32_9 = arith.constant 0 : i32
    %11 = arith.cmpi ne, %10, %c0_i32_9 : i32
    scf.if %11 {
      %c0_10 = arith.constant 0 : index
      %c0_11 = arith.constant 0 : index
      %12 = vector.load %arg6[%c0_10, %c0_11] : memref<16x128xf32, #tpu.memory_space<vmem>>, vector<16x128xf32>
      %c0_12 = arith.constant 0 : index
      %c0_13 = arith.constant 0 : index
      %13 = vector.load %arg4[%c0_12, %c0_13] : memref<1x128xf32, #tpu.memory_space<vmem>>, vector<1x128xf32>
      %14 = vector.broadcast %13 : vector<1x128xf32> to vector<16x128xf32>
      %15 = arith.addf %12, %14 : vector<16x128xf32>
      %cst_14 = arith.constant 0.000000e+00 : f32
      %16 = vector.broadcast %cst_14 : f32 to vector<16x128xf32>
      %17 = arith.maximumf %15, %16 : vector<16x128xf32>
      %c0_15 = arith.constant 0 : index
      %c0_16 = arith.constant 0 : index
      %18 = vector.load %arg5[%c0_15, %c0_16] : memref<16x128xf32, #tpu.memory_space<vmem>>, vector<16x128xf32>
      tpu.vector_store %arg5[%c0_15, %c0_16], %17 {strides = array<i32>} : memref<16x128xf32, #tpu.memory_space<vmem>>, vector<16x128xf32>,
    } else {
    }
    return
  }
  func.func @transform_0(%arg0: i32, %arg1: i32) -> (i32, i32) {
    %c0_i32 = arith.constant 0 : i32
    return %arg0, %arg1 : i32, i32
  }
  func.func @transform_1(%arg0: i32, %arg1: i32) -> (i32, i32) {
    %c0_i32 = arith.constant 0 : i32
    %c0_i32_0 = arith.constant 0 : i32
    return %arg1, %c0_i32 : i32, i32
  }
  func.func @transform_2(%arg0: i32, %arg1: i32) -> (i32, i32) {
    %c0_i32 = arith.constant 0 : i32
    %c0_i32_0 = arith.constant 0 : i32
    %c0_i32_1 = arith.constant 0 : i32
    return %c0_i32, %c0_i32_0 : i32, i32
  }
  func.func @transform_3(%arg0: i32, %arg1: i32) -> (i32, i32) {
    %c0_i32 = arith.constant 0 : i32
    %c0_i32_0 = arith.constant 0 : i32
    return %arg0, %c0_i32 : i32, i32
  }
}

</mosaic_0001>

<bundles_post_ra>
// kernel: shared_encoder_forward.2
= control target key start
LH: loop header
LB: loop body
LE: loop exit
PB: predicated region body
PF: predicated region fallthrough
CT: control target
= control target key end

     0   :  { %s238_s1 = inlined_call_operand.vmem [shape: f32[128,128], index: 1, kind: input, shape index: {}]   ;;  %s239_s0 = inlined_call_operand.vmem [shape: f32[16,128], index: 0, kind: input, shape index: {}]   ;;  %s240_s2 = inlined_call_operand.vmem [shape: f32[16,128], index: 2, kind: output, shape index: {}]  }
   0x1   :  { %v28_v0 = vld [vmem:[%s238_s1 + $0x78] sm:$0xff]  ;;  %v27_v1 = vld [vmem:[%s238_s1 + $0x70] sm:$0xff]  ;;  %v26_v2 = vld [vmem:[%s238_s1 + $0x68] sm:$0xff] }
   0x2   :  { %128 = vmatprep.subr.mxu0 %v28_v0  ;;  %v25_v3 = vld [vmem:[%s238_s1 + $0x60] sm:$0xff]  ;;  %v24_v5 = vld [vmem:[%s238_s1 + $0x58] sm:$0xff]  ;;  %v23_v6 = vld [vmem:[%s238_s1 + $0x50] sm:$0xff] }
   0x3   :  { %129 = vmatpush3.msra.mxu0 %v28_v0  ;;  %v11_v4 = vld [vmem:[%s239_s0] sm:$0xff]  ;;  %v22_v7 = vld [vmem:[%s238_s1 + $0x48] sm:$0xff]  ;;  %v20_v9 = vld [vmem:[%s238_s1 + $0x38] sm:$0xff] }
   0x4   :  { %130 = vmatprep.subr.mxu0 %v27_v1  ;;  %160 = vmatprep.mubr.f32.mxu0 %v11_v4  ;;  %v21_v8 = vld [vmem:[%s238_s1 + $0x40] sm:$0xff]  ;;  %v19_v10 = vld [vmem:[%s238_s1 + $0x30] sm:$0xff]  ;;  %v18_v11 = vld [vmem:[%s238_s1 + $0x28] sm:$0xff] }
   0x5   :  { %131 = vmatpush3.msra.mxu0 %v27_v1  ;;  %v17_v12 = vld [vmem:[%s238_s1 + $0x20] sm:$0xff]  ;;  %v16_v13 = vld [vmem:[%s238_s1 + $0x18] sm:$0xff]  ;;  %v15_v14 = vld [vmem:[%s238_s1 + $0x10] sm:$0xff] }
   0x6   :  { %132 = vmatprep.subr.mxu0 %v26_v2  ;;  %v14_v15 = vld [vmem:[%s238_s1 + $0x8] sm:$0xff]  ;;  %v13_v16 = vld [vmem:[%s238_s1] sm:$0xff] }
   0x7   :  { %133 = vmatpush3.msra.mxu0 %v26_v2  ;;  %v12_v17 = vld [vmem:[%s239_s0 + $0x8] sm:$0xff] }
   0x8   :  { %134 = vmatprep.subr.mxu0 %v25_v3 }
   0x9   :  { %135 = vmatpush3.msra.mxu0 %v25_v3 }
   0xa   :  { %136 = vmatprep.subr.mxu0 %v24_v5 }
   0xb   :  { %137 = vmatpush3.msra.mxu0 %v24_v5 }
   0xc   :  { %138 = vmatprep.subr.mxu0 %v23_v6 }
   0xd   :  { %139 = vmatpush3.msra.mxu0 %v23_v6 }
   0xe   :  { %140 = vmatprep.subr.mxu0 %v22_v7 }
   0xf   :  { %141 = vmatpush3.msra.mxu0 %v22_v7 }
  0x10   :  { %142 = vmatprep.subr.mxu0 %v21_v8 }
  0x11   :  { %143 = vmatpush3.msra.mxu0 %v21_v8 }
  0x12   :  { %144 = vmatprep.subr.mxu0 %v20_v9 }
  0x13   :  { %145 = vmatpush3.msra.mxu0 %v20_v9 }
  0x14   :  { %146 = vmatprep.subr.mxu0 %v19_v10 }
  0x15   :  { %147 = vmatpush3.msra.mxu0 %v19_v10 }
  0x16   :  { %148 = vmatprep.subr.mxu0 %v18_v11 }
  0x17   :  { %149 = vmatpush3.msra.mxu0 %v18_v11 }
  0x18   :  { %150 = vmatprep.subr.mxu0 %v17_v12 }
  0x19   :  { %151 = vmatpush3.msra.mxu0 %v17_v12 }
  0x1a   :  { %152 = vmatprep.subr.mxu0 %v16_v13 }
  0x1b   :  { %153 = vmatpush3.msra.mxu0 %v16_v13 }
  0x1c   :  { %154 = vmatprep.subr.mxu0 %v15_v14 }
  0x1d   :  { %155 = vmatpush3.msra.mxu0 %v15_v14 }
  0x1e   :  { %156 = vmatprep.subr.mxu0 %v14_v15 }
  0x1f   :  { %157 = vmatpush3.msra.mxu0 %v14_v15 }
  0x20   :  { %158 = vmatprep.subr.mxu0 %v13_v16 }
  0x21   :  { %159 = vmatpush3.msra.mxu0 %v13_v16 }
  0x22   :  { %161 = vmatmul.mubr.f32.vlgmr.msra.gmra.mxu0 %v12_v17 }
  0xe2   :  { %v162_v18 = vpop.f32.mrf.mxu0 }
  0xe3   :  { %105 = vst [vmem:[%s240_s2 + $0x8] sm:$0xff] %v162_v18 }
  0xe4   :  { %v95_v19 = vpop.f32.mrf.mxu0 }
  0xe5   :  { %104 = vst [vmem:[%s240_s2] sm:$0xff] %v95_v19 }

// kernel: shared_encoder_forward.3
= control target key start
LH: loop header
LB: loop body
LE: loop exit
PB: predicated region body
PF: predicated region fallthrough
CT: control target
= control target key end

     0   :  { %vm27_vm0 = vcmask 130048   ;;  %s227_s0 = inlined_call_operand.vmem [shape: f32[16,16], index: 0, kind: input, shape index: {}]   ;;  %s228_s1 = inlined_call_operand.vmem [shape: f32[16,128], index: 1, kind: input, shape index: {}]   ;;  %s229_s2 = inlined_call_operand.vmem [shape: f32[1,128], index: 2, kind: input, shape index: {}]   ;;  %s230_s3 = inlined_call_operand.hbm [shape: f32[16,128], index: 3, kind: output, shape index: {}]  }
   0x1   :  { %v26_v0 = vld [vmem:[%s228_s1 + $0x8] sm:$0xff]  ;;  %v25_v1 = vld [vmem:[%s228_s1] sm:$0xff] }
   0x2   :  { %v23_v2 = vld [vmem:[%s227_s0] sm:$0xff]  ;;  %154 = vmatprep.subr.mxu0 %v26_v0 }
   0x3   :  { %158 = vmatprep.mubr.msk.f32.mxu0 %vm27_vm0, %v23_v2 }
   0x4   :  { %8 = vsyncpa [#allocation4], 0  ;;  %155 = vmatpush3.msra.mxu0 %v26_v0  ;;  %v24_v3 = vld [vmem:[%s227_s0 + $0x8] sm:$0xff]  ;;  %v149_v4 = vld [vmem:[%s229_s2] ss:$0 sm:$0xff]  ;;  %s186_s1 = smov [#allocation3]  }
   0x5   :  { %156 = vmatprep.subr.mxu0 %v25_v1  ;;  %s136_s22 = sshll.u32 %s186_s1, 4  ;;  %s137_s22 = int_to_ptr.vmem [resolvable:$true] %s136_s22 }
   0x6   :  { %157 = vmatpush3.msra.mxu0 %v25_v1  ;;  %s164_s23 = scalar_lea.vmem %s137_s22, 256  ;;  %p169_p1 = scmp.lt.s32.totalorder %s137_s22, %s137_s22 }
   0x7   :  { %159 = vmatmul.mubr.msk.f32.vlgmr.msra.gmra.mxu0 %vm27_vm0, %v24_v3  ;;  %p165_p0 = scmp.ne.s32.totalorder %s137_s22, %s164_s23  ;;  %p170_p2 = scmp.lt.s32.totalorder %s164_s23, %s164_s23 }
   0x9   :  { %p171_p3 = por %p170_p2, %p169_p1 }
   0xb   :  { %p172_p4 = pnand %p171_p3, %p165_p0 }
  0xc7   :  { %v160_v5 = vpop.f32.mrf.mxu0 }
  0xc8   :  { %v126_v6 = vadd.f32 %v160_v5, %v149_v4 }
  0xc9   :  { %v100_v7 = vpop.f32.mrf.mxu0 }
  0xca   :  { %v128_v8 = vmax.f32 %v126_v6, 0.0  ;;  %v125_v9 = vadd.f32 %v149_v4, %v100_v7 }
  0xcc   :  { %130 = vst [vmem:[#allocation3 + $0x8] sm:$0xff] %v128_v8  ;;  %v127_v10 = vmax.f32 %v125_v9, 0.0 }
  0xce   :  { %129 = vst [vmem:[#allocation3] sm:$0xff] %v127_v10 }
  0xcf   :  { %175 = shalt.err (!%p172_p4)
}
  0xd0   :  { %s187_s0 = smov 128   ;;  %s188_s2 = smov 8  }
  0xd1   :  { %142 = dma.vmem_to_hbm [thread:$0]  %s137_s22, 256, %s230_s3, [#allocation4], %s187_s0, %s187_s0, %s188_s2  }
  0xd2   :  { %184 = dma.done.wait [#allocation4], 256  }
  0xd3   :  { %185 = vsyncadd [#allocation4], 4294967040 }
  0xd4   :  { %146 = vsyncpa [#allocation4], 1 }

</bundles_post_ra>
